<compile_context>
chip_gen: v7x
topology: tpu7x:2x2x1
jax: 0.10.0
libtpu: 0.0.40
codegen_flags: <defaults>
</compile_context>

<pallas_src>
import jax
import jax.numpy as jnp
from jax.experimental import pallas as pl
from jax.experimental.pallas import tpu as pltpu

OBS_DIM = 28
ACT_DIM = 2
HIDDEN = 64
LANE = 128                      # every feature dim is handled as a 128-lane slab
EPS = 1e-5

# parameter-slab row offsets
W1_OFF = 0
W2_OFF = LANE
W3_OFF = 2 * LANE
BIAS_OFF = 3 * LANE
SLAB_ROWS = 3 * LANE + 8        # 392 rows (multiple of 8)

_MXU_STATS_MIN_BATCH = 128      # below this, jnp.sum reductions are cheaper
_MIN_VMEM_LIMIT = 32 * 1024 * 1024


# --------------------------------------------------------------------------
# Kernel
# --------------------------------------------------------------------------
def setup_table_movenet_kernel(x_ref, p_ref, o_ref, xpad_ref):
    B = x_ref.shape[0]
    inv_b = 1.0 / B                              # static: true batch size
    use_mxu_stats = B >= _MXU_STATS_MIN_BATCH
    ones_row = jnp.ones((1, B), jnp.float32) if use_mxu_stats else None

    def bn_norm(h):
        # One-pass batch statistics (sum and sum-of-squares together).
        # Large B: offload both reductions to the MXU (idle between layers);
        # small B: plain XLU reductions.  Statistics math stays f32.
        if use_mxu_stats:
            s = jnp.dot(ones_row, h, preferred_element_type=jnp.float32)
            s2 = jnp.dot(ones_row, h * h, preferred_element_type=jnp.float32)
        else:
            s = jnp.sum(h, axis=0, keepdims=True)
            s2 = jnp.sum(h * h, axis=0, keepdims=True)
        mean = s * inv_b
        var = jnp.maximum(s2 * inv_b - mean * mean, 0.0)
        # rsqrt lands on the EUP slot; zero-padded lanes stay exactly zero.
        return (h - mean) * jax.lax.rsqrt(var + EPS)

    # Pad the raw (B, OBS_DIM) observation to a 128-lane slab inside VMEM so
    # every downstream VPU/MXU op is a clean full-lane operation and padded
    # lanes are guaranteed zero (no HBM pad copy in the wrapper).
    xpad_ref[...] = jnp.zeros_like(xpad_ref)
    xpad_ref[:, 0:OBS_DIM] = x_ref[...]
    x = xpad_ref[...]                            # (B, 128) f32

    # Parameter slab: aligned static ref slices (rows 0/128/256/384).
    w1 = p_ref[W1_OFF:W1_OFF + LANE, :]          # (128, 128)
    w2 = p_ref[W2_OFF:W2_OFF + LANE, :]
    w3 = p_ref[W3_OFF:W3_OFF + LANE, :]
    biases = p_ref[BIAS_OFF:BIAS_OFF + 8, :].astype(jnp.float32)   # (8, 128)

    # Layer 1: bn1 (normalize only; affine folded into w1/b1) -> fc1 -> relu
    h = bn_norm(x)
    h = jnp.dot(h.astype(w1.dtype), w1,
                preferred_element_type=jnp.float32) + biases[0:1, :]
    h = jnp.maximum(h, 0.0)

    # Layer 2: bn2 -> fc2 -> relu
    h = bn_norm(h)
    h = jnp.dot(h.astype(w2.dtype), w2,
                preferred_element_type=jnp.float32) + biases[1:2, :]
    h = jnp.maximum(h, 0.0)

    # Layer 3: bn3 -> fc3 (no activation)
    h = bn_norm(h)
    out = jnp.dot(h.astype(w3.dtype), w3,
                  preferred_element_type=jnp.float32) + biases[2:3, :]

    # Narrow (B, ACT_DIM) store: 64x less HBM writeback than a lane-dense slab
    # and no wrapper-side slice copy.  The masked vst is negligible next to
    # the three 128x128 matmuls at any batch size this design supports.
    o_ref[...] = out[:, 0:ACT_DIM].astype(o_ref.dtype)


# --------------------------------------------------------------------------
# Parameter construction / preparation
# --------------------------------------------------------------------------
def init_params(key):
    """Deterministic parameter init matching the PyTorch module's shapes."""
    ks = jax.random.split(key, 6)

    def linear_init(kw, kb, fan_in, fan_out):
        # PyTorch nn.Linear default: U(-1/sqrt(fan_in), 1/sqrt(fan_in))
        bound = 1.0 / jnp.sqrt(jnp.float32(fan_in))
        w = jax.random.uniform(kw, (fan_in, fan_out), jnp.float32, -bound, bound)
        b = jax.random.uniform(kb, (1, fan_out), jnp.float32, -bound, bound)
        return w, b

    w1, b1 = linear_init(ks[0], ks[1], OBS_DIM, HIDDEN)
    w2, b2 = linear_init(ks[2], ks[3], HIDDEN, HIDDEN)
    w3, b3 = linear_init(ks[4], ks[5], HIDDEN, ACT_DIM)

    return {
        # BatchNorm1d defaults: gamma=1, beta=0 (kept general in the folding)
        "bn1_g": jnp.ones((1, OBS_DIM), jnp.float32),
        "bn1_b": jnp.zeros((1, OBS_DIM), jnp.float32),
        "w1": w1, "b1": b1,
        "bn2_g": jnp.ones((1, HIDDEN), jnp.float32),
        "bn2_b": jnp.zeros((1, HIDDEN), jnp.float32),
        "w2": w2, "b2": b2,
        "bn3_g": jnp.ones((1, HIDDEN), jnp.float32),
        "bn3_b": jnp.zeros((1, HIDDEN), jnp.float32),
        "w3": w3, "b3": b3,
    }


def prepare_params(params, matmul_dtype=jnp.float32):
    """Fold BN affine into the Linears and pack everything into ONE slab.

    Returns a (3*128 + 8, 128) array: rows [0,128) = w1, [128,256) = w2,
    [256,384) = w3 (all zero-padded to 128x128), rows 384..386 = b1/b2/b3.

    matmul_dtype=jnp.bfloat16 halves the parameter DMA bytes and is
    recommended on ALL generations (v5e/v6e/v7x MXUs are bf16-native); keep
    f32 for exact parity with the PyTorch reference.  BN statistics stay f32
    inside the kernel regardless.
    """
    def fold(gamma, beta, w, b):
        # BN(h) @ W + b = ((h-mu)*inv_std) @ (gamma^T * W) + (beta @ W + b)
        w_f = gamma.reshape(-1, 1) * w          # row-scale (in, out)
        b_f = b + beta @ w                      # (1, out)
        return w_f, b_f

    w1, b1 = fold(params["bn1_g"], params["bn1_b"], params["w1"], params["b1"])
    w2, b2 = fold(params["bn2_g"], params["bn2_b"], params["w2"], params["b2"])
    w3, b3 = fold(params["bn3_g"], params["bn3_b"], params["w3"], params["b3"])

    slab = jnp.zeros((SLAB_ROWS, LANE), jnp.float32)
    slab = slab.at[W1_OFF:W1_OFF + OBS_DIM, 0:HIDDEN].set(w1)
    slab = slab.at[W2_OFF:W2_OFF + HIDDEN, 0:HIDDEN].set(w2)
    slab = slab.at[W3_OFF:W3_OFF + HIDDEN, 0:ACT_DIM].set(w3)
    slab = slab.at[BIAS_OFF + 0, 0:HIDDEN].set(b1[0])
    slab = slab.at[BIAS_OFF + 1, 0:HIDDEN].set(b2[0])
    slab = slab.at[BIAS_OFF + 2, 0:ACT_DIM].set(b3[0])
    return slab.astype(matmul_dtype)


# --------------------------------------------------------------------------
# VMEM budget (generation-aware)
# --------------------------------------------------------------------------
def _vmem_budget_bytes():
    """~3/4 of per-core VMEM (v5e/v6e: ~96 MiB, v7x: ~48 MiB), >= 32 MiB."""
    try:
        cap = int(pltpu.get_tpu_info().vmem_capacity_bytes)
        if cap > 0:
            return max(_MIN_VMEM_LIMIT, min((cap * 3) // 4, 100 * 1024 * 1024))
    except Exception:
        pass
    return _MIN_VMEM_LIMIT


# --------------------------------------------------------------------------
# Wrapper
# --------------------------------------------------------------------------
def setup_table_movenet(x, param_slab):
    """Forward pass. x: (obs_dim,) or (B, obs_dim); param_slab from prepare_params."""
    is_one_dim = x.ndim == 1
    if is_one_dim:
        x = x[None, :]
    x = jnp.asarray(x, jnp.float32)
    B, D = x.shape
    assert D == OBS_DIM, f"expected obs dim {OBS_DIM}, got {D}"

    # Whole-batch VMEM ceiling: input + pad scratch + output + a few live
    # (B, 128) f32 intermediates, plus the parameter slab.
    budget = _vmem_budget_bytes()
    per_row_bytes = 8 * LANE * 4
    slab_bytes = int(param_slab.size) * param_slab.dtype.itemsize
    required = B * per_row_bytes + slab_bytes + 2 * 1024 * 1024
    if required > budget:
        # TODO(synk): fall back to the two-pass tiled/parallel-grid variant here.
        raise ValueError(
            f"batch {B} exceeds the whole-batch VMEM ceiling "
            f"(~{(budget - slab_bytes) // per_row_bytes} rows on this chip)")
    vmem_limit = max(_MIN_VMEM_LIMIT, required)

    vmem = pl.BlockSpec(memory_space=pltpu.MemorySpace.VMEM)
    out = pl.pallas_call(
        setup_table_movenet_kernel,
        out_shape=jax.ShapeDtypeStruct((B, ACT_DIM), jnp.float32),
        in_specs=[vmem, vmem],
        out_specs=vmem,
        scratch_shapes=[pltpu.VMEM((B, LANE), jnp.float32)],
        compiler_params=pltpu.CompilerParams(vmem_limit_bytes=vmem_limit),
    )(x, param_slab)

    return out[0] if is_one_dim else out


# --------------------------------------------------------------------------
# Pure-JAX reference (identical semantics, unfolded params)
# --------------------------------------------------------------------------
def reference_forward(x, params):
    is_one_dim = x.ndim == 1
    if is_one_dim:
        x = x[None, :]

    def bn(h, g, b):
        m = jnp.mean(h, axis=0, keepdims=True)
        v = jnp.mean((h - m) ** 2, axis=0, keepdims=True)
        return (h - m) / jnp.sqrt(v + EPS) * g + b

    h = jnp.maximum(bn(x, params["bn1_g"], params["bn1_b"]) @ params["w1"] + params["b1"], 0.0)
    h = jnp.maximum(bn(h, params["bn2_g"], params["bn2_b"]) @ params["w2"] + params["b2"], 0.0)
    o = bn(h, params["bn3_g"], params["bn3_b"]) @ params["w3"] + params["b3"]
    return o[0] if is_one_dim else o


if __name__ == "__main__":
    key = jax.random.PRNGKey(0)
    k_params, k_x, k_xl = jax.random.split(key, 3)

    params = init_params(k_params)
    slab_f32 = prepare_params(params)                    # exact-parity f32 slab
    slab_bf16 = prepare_params(params, jnp.bfloat16)     # half the param DMA bytes

    # Small batch, f32 params (exact parity with the reference).
    B = 8
    x = jax.random.normal(k_x, (B, OBS_DIM), jnp.float32)
    out = jax.block_until_ready(setup_table_movenet(x, slab_f32))
    ref = reference_forward(x, params)
    assert out.shape == (B, ACT_DIM)
    assert jnp.allclose(out, ref, atol=1e-4, rtol=1e-4), "mismatch vs reference"

    # 1-D input path (degenerate B=1 training-mode BN; matches the JAX
    # reference here -- note real PyTorch BatchNorm1d errors on batch=1 in
    # training mode, so this path is a documented semantic divergence).
    out1d = jax.block_until_ready(setup_table_movenet(x[0], slab_f32))
    ref1d = reference_forward(x[0], params)
    assert out1d.shape == (ACT_DIM,)
    assert jnp.allclose(out1d, ref1d, atol=1e-4, rtol=1e-4), "1-D mismatch vs reference"

    # Larger batch exercises the MXU-offloaded batch-statistics path.
    BL = 256
    xl = jax.random.normal(k_xl, (BL, OBS_DIM), jnp.float32)
    outl = jax.block_until_ready(setup_table_movenet(xl, slab_f32))
    refl = reference_forward(xl, params)
    assert outl.shape == (BL, ACT_DIM)
    assert jnp.allclose(outl, refl, atol=1e-3, rtol=1e-3), "large-batch mismatch"

    # bf16 parameter slab (recommended on all generations); looser tolerance.
    outb = jax.block_until_ready(setup_table_movenet(x, slab_bf16))
    assert bool(jnp.all(jnp.isfinite(outb)))
    assert jnp.allclose(outb, ref, atol=1e-1, rtol=1e-1), "bf16 mismatch vs reference"

    print("KERNEL_OK")
</pallas_src>

<mosaic_0001>
module attributes {stable_mosaic.version = 11 : i64} {
  func.func @setup_table_movenet_kernel(%arg0: memref<8x28xf32, #tpu.memory_space<vmem>>, %arg1: memref<392x128xf32, #tpu.memory_space<vmem>>, %arg2: memref<8x2xf32, #tpu.memory_space<vmem>>, %arg3: memref<8x128xf32, #tpu.memory_space<vmem>>) attributes {dimension_semantics = [], scalar_prefetch = 0 : i64, scratch_operands = 1 : i64, tpu.core_type = #tpu.core_type<tc>} {
    %cst = arith.constant 0.000000e+00 : f32
    %0 = vector.broadcast %cst : f32 to vector<8x128xf32>
    %c0 = arith.constant 0 : index
    %c0_0 = arith.constant 0 : index
    %1 = vector.load %arg3[%c0, %c0_0] : memref<8x128xf32, #tpu.memory_space<vmem>>, vector<8x128xf32>
    tpu.vector_store %arg3[%c0, %c0_0], %0 {strides = array<i32>} : memref<8x128xf32, #tpu.memory_space<vmem>>, vector<8x128xf32>,
    %c0_1 = arith.constant 0 : index
    %c0_2 = arith.constant 0 : index
    %2 = vector.load %arg0[%c0_1, %c0_2] : memref<8x28xf32, #tpu.memory_space<vmem>>, vector<8x28xf32>
    %c0_3 = arith.constant 0 : index
    %c0_4 = arith.constant 0 : index
    %3 = vector.load %arg3[%c0_3, %c0_4] : memref<8x128xf32, #tpu.memory_space<vmem>>, vector<8x28xf32>
    tpu.vector_store %arg3[%c0_3, %c0_4], %2 {strides = array<i32>} : memref<8x128xf32, #tpu.memory_space<vmem>>, vector<8x28xf32>,
    %c0_5 = arith.constant 0 : index
    %c0_6 = arith.constant 0 : index
    %4 = vector.load %arg3[%c0_5, %c0_6] : memref<8x128xf32, #tpu.memory_space<vmem>>, vector<8x128xf32>
    %c0_7 = arith.constant 0 : index
    %c0_8 = arith.constant 0 : index
    %5 = vector.load %arg1[%c0_7, %c0_8] : memref<392x128xf32, #tpu.memory_space<vmem>>, vector<128x128xf32>
    %c128 = arith.constant 128 : index
    %c0_9 = arith.constant 0 : index
    %6 = vector.load %arg1[%c128, %c0_9] : memref<392x128xf32, #tpu.memory_space<vmem>>, vector<128x128xf32>
    %c256 = arith.constant 256 : index
    %c0_10 = arith.constant 0 : index
    %7 = vector.load %arg1[%c256, %c0_10] : memref<392x128xf32, #tpu.memory_space<vmem>>, vector<128x128xf32>
    %c384 = arith.constant 384 : index
    %c0_11 = arith.constant 0 : index
    %8 = vector.load %arg1[%c384, %c0_11] : memref<392x128xf32, #tpu.memory_space<vmem>>, vector<8x128xf32>
    %cst_12 = arith.constant dense<0.000000e+00> : vector<128xf32>
    %9 = vector.multi_reduction <add>, %4, %cst_12 [0] : vector<8x128xf32> to vector<128xf32>
    %10 = vector.shape_cast %9 : vector<128xf32> to vector<1x128xf32>
    %11 = arith.mulf %4, %4 : vector<8x128xf32>
    %cst_13 = arith.constant dense<0.000000e+00> : vector<128xf32>
    %12 = vector.multi_reduction <add>, %11, %cst_13 [0] : vector<8x128xf32> to vector<128xf32>
    %13 = vector.shape_cast %12 : vector<128xf32> to vector<1x128xf32>
    %cst_14 = arith.constant 1.250000e-01 : f32
    %14 = vector.broadcast %cst_14 : f32 to vector<1x128xf32>
    %15 = arith.mulf %10, %14 : vector<1x128xf32>
    %cst_15 = arith.constant 1.250000e-01 : f32
    %16 = vector.broadcast %cst_15 : f32 to vector<1x128xf32>
    %17 = arith.mulf %13, %16 : vector<1x128xf32>
    %18 = arith.mulf %15, %15 : vector<1x128xf32>
    %19 = arith.subf %17, %18 : vector<1x128xf32>
    %cst_16 = arith.constant 0.000000e+00 : f32
    %20 = vector.broadcast %cst_16 : f32 to vector<1x128xf32>
    %21 = arith.maximumf %19, %20 : vector<1x128xf32>
    %22 = vector.broadcast %15 : vector<1x128xf32> to vector<8x128xf32>
    %23 = arith.subf %4, %22 : vector<8x128xf32>
    %cst_17 = arith.constant 9.99999974E-6 : f32
    %24 = vector.broadcast %cst_17 : f32 to vector<1x128xf32>
    %25 = arith.addf %21, %24 : vector<1x128xf32>
    %26 = math.rsqrt %25 : vector<1x128xf32>
    %27 = vector.broadcast %26 : vector<1x128xf32> to vector<8x128xf32>
    %28 = arith.mulf %23, %27 : vector<8x128xf32>
    %cst_18 = arith.constant dense<0.000000e+00> : vector<8x128xf32>
    %29 = tpu.matmul %28, %5, %cst_18 {dimension_numbers = #tpu.dot_dimension_numbers<[1], [0], [0], [1], [0, 0, 1, 1], [], []>} : vector<8x128xf32>, vector<128x128xf32>, vector<8x128xf32> -> vector<8x128xf32>
    %30 = vector.extract_strided_slice %8 {offsets = [0, 0], sizes = [1, 128], strides = [1, 1]} : vector<8x128xf32> to vector<1x128xf32>
    %31 = vector.broadcast %30 : vector<1x128xf32> to vector<8x128xf32>
    %32 = arith.addf %29, %31 : vector<8x128xf32>
    %cst_19 = arith.constant 0.000000e+00 : f32
    %33 = vector.broadcast %cst_19 : f32 to vector<8x128xf32>
    %34 = arith.maximumf %32, %33 : vector<8x128xf32>
    %cst_20 = arith.constant dense<0.000000e+00> : vector<128xf32>
    %35 = vector.multi_reduction <add>, %34, %cst_20 [0] : vector<8x128xf32> to vector<128xf32>
    %36 = vector.shape_cast %35 : vector<128xf32> to vector<1x128xf32>
    %37 = arith.mulf %34, %34 : vector<8x128xf32>
    %cst_21 = arith.constant dense<0.000000e+00> : vector<128xf32>
    %38 = vector.multi_reduction <add>, %37, %cst_21 [0] : vector<8x128xf32> to vector<128xf32>
    %39 = vector.shape_cast %38 : vector<128xf32> to vector<1x128xf32>
    %cst_22 = arith.constant 1.250000e-01 : f32
    %40 = vector.broadcast %cst_22 : f32 to vector<1x128xf32>
    %41 = arith.mulf %36, %40 : vector<1x128xf32>
    %cst_23 = arith.constant 1.250000e-01 : f32
    %42 = vector.broadcast %cst_23 : f32 to vector<1x128xf32>
    %43 = arith.mulf %39, %42 : vector<1x128xf32>
    %44 = arith.mulf %41, %41 : vector<1x128xf32>
    %45 = arith.subf %43, %44 : vector<1x128xf32>
    %cst_24 = arith.constant 0.000000e+00 : f32
    %46 = vector.broadcast %cst_24 : f32 to vector<1x128xf32>
    %47 = arith.maximumf %45, %46 : vector<1x128xf32>
    %48 = vector.broadcast %41 : vector<1x128xf32> to vector<8x128xf32>
    %49 = arith.subf %34, %48 : vector<8x128xf32>
    %cst_25 = arith.constant 9.99999974E-6 : f32
    %50 = vector.broadcast %cst_25 : f32 to vector<1x128xf32>
    %51 = arith.addf %47, %50 : vector<1x128xf32>
    %52 = math.rsqrt %51 : vector<1x128xf32>
    %53 = vector.broadcast %52 : vector<1x128xf32> to vector<8x128xf32>
    %54 = arith.mulf %49, %53 : vector<8x128xf32>
    %cst_26 = arith.constant dense<0.000000e+00> : vector<8x128xf32>
    %55 = tpu.matmul %54, %6, %cst_26 {dimension_numbers = #tpu.dot_dimension_numbers<[1], [0], [0], [1], [0, 0, 1, 1], [], []>} : vector<8x128xf32>, vector<128x128xf32>, vector<8x128xf32> -> vector<8x128xf32>
    %56 = vector.extract_strided_slice %8 {offsets = [1, 0], sizes = [1, 128], strides = [1, 1]} : vector<8x128xf32> to vector<1x128xf32>
    %57 = vector.broadcast %56 : vector<1x128xf32> to vector<8x128xf32>
    %58 = arith.addf %55, %57 : vector<8x128xf32>
    %cst_27 = arith.constant 0.000000e+00 : f32
    %59 = vector.broadcast %cst_27 : f32 to vector<8x128xf32>
    %60 = arith.maximumf %58, %59 : vector<8x128xf32>
    %cst_28 = arith.constant dense<0.000000e+00> : vector<128xf32>
    %61 = vector.multi_reduction <add>, %60, %cst_28 [0] : vector<8x128xf32> to vector<128xf32>
    %62 = vector.shape_cast %61 : vector<128xf32> to vector<1x128xf32>
    %63 = arith.mulf %60, %60 : vector<8x128xf32>
    %cst_29 = arith.constant dense<0.000000e+00> : vector<128xf32>
    %64 = vector.multi_reduction <add>, %63, %cst_29 [0] : vector<8x128xf32> to vector<128xf32>
    %65 = vector.shape_cast %64 : vector<128xf32> to vector<1x128xf32>
    %cst_30 = arith.constant 1.250000e-01 : f32
    %66 = vector.broadcast %cst_30 : f32 to vector<1x128xf32>
    %67 = arith.mulf %62, %66 : vector<1x128xf32>
    %cst_31 = arith.constant 1.250000e-01 : f32
    %68 = vector.broadcast %cst_31 : f32 to vector<1x128xf32>
    %69 = arith.mulf %65, %68 : vector<1x128xf32>
    %70 = arith.mulf %67, %67 : vector<1x128xf32>
    %71 = arith.subf %69, %70 : vector<1x128xf32>
    %cst_32 = arith.constant 0.000000e+00 : f32
    %72 = vector.broadcast %cst_32 : f32 to vector<1x128xf32>
    %73 = arith.maximumf %71, %72 : vector<1x128xf32>
    %74 = vector.broadcast %67 : vector<1x128xf32> to vector<8x128xf32>
    %75 = arith.subf %60, %74 : vector<8x128xf32>
    %cst_33 = arith.constant 9.99999974E-6 : f32
    %76 = vector.broadcast %cst_33 : f32 to vector<1x128xf32>
    %77 = arith.addf %73, %76 : vector<1x128xf32>
    %78 = math.rsqrt %77 : vector<1x128xf32>
    %79 = vector.broadcast %78 : vector<1x128xf32> to vector<8x128xf32>
    %80 = arith.mulf %75, %79 : vector<8x128xf32>
    %cst_34 = arith.constant dense<0.000000e+00> : vector<8x128xf32>
    %81 = tpu.matmul %80, %7, %cst_34 {dimension_numbers = #tpu.dot_dimension_numbers<[1], [0], [0], [1], [0, 0, 1, 1], [], []>} : vector<8x128xf32>, vector<128x128xf32>, vector<8x128xf32> -> vector<8x128xf32>
    %82 = vector.extract_strided_slice %8 {offsets = [2, 0], sizes = [1, 128], strides = [1, 1]} : vector<8x128xf32> to vector<1x128xf32>
    %83 = vector.broadcast %82 : vector<1x128xf32> to vector<8x128xf32>
    %84 = arith.addf %81, %83 : vector<8x128xf32>
    %85 = vector.extract_strided_slice %84 {offsets = [0, 0], sizes = [8, 2], strides = [1, 1]} : vector<8x128xf32> to vector<8x2xf32>
    %c0_35 = arith.constant 0 : index
    %c0_36 = arith.constant 0 : index
    %86 = vector.load %arg2[%c0_35, %c0_36] : memref<8x2xf32, #tpu.memory_space<vmem>>, vector<8x2xf32>
    tpu.vector_store %arg2[%c0_35, %c0_36], %85 {strides = array<i32>} : memref<8x2xf32, #tpu.memory_space<vmem>>, vector<8x2xf32>,
    return
  }
}

</mosaic_0001>

<bundles_post_ra>
// kernel: tpu_custom_call.1
= control target key start
LH: loop header
LB: loop body
LE: loop exit
PB: predicated region body
PF: predicated region fallthrough
CT: control target
= control target key end

     0   :  { %7 = vsyncpa [#allocation4], 0  ;;  %s775_s0 = inlined_call_operand.hbm [shape: f32[8,28], index: 0, kind: input, shape index: {}]   ;;  %s776_s1 = inlined_call_operand.hbm [shape: f32[392,128], index: 1, kind: input, shape index: {}]   ;;  %s777_s2 = inlined_call_operand.vmem [shape: f32[8,2], index: 2, kind: output, shape index: {}]  }
   0x1   :  { %8 = vsyncpa [#allocation6], 0  ;;  %s678_s9 = smov [#allocation3]   ;;  %s679_s11 = smov [#allocation5]  }
   0x2   :  { %s15_s10 = sshll.u32 %s678_s9, 4  ;;  %s24_s12 = sshll.u32 %s679_s11, 4  ;;  %s16_s10 = int_to_ptr.vmem [resolvable:$true] %s15_s10  ;;  %s700_s12 = int_to_ptr.vmem [resolvable:$true] %s24_s12 }
   0x3   :  { %s630_s15 = scalar_lea.hbm %s775_s0, 128 }
   0x4   :  { %p631_p0 = scmp.ne.s32.totalorder %s775_s0, %s630_s15  ;;  %p634_p1 = scmp.lt.u32.totalorder %s630_s15, %s775_s0 }
   0x6   :  { %p636_p2 = pnand %p634_p1, %p631_p0 }
   0x8   :  { %639 = shalt.err (!%p636_p2)
}
   0x9   :  { %s640_s20 = scalar_lea.vmem %s16_s10, 128  ;;  %p645_p4 = scmp.lt.s32.totalorder %s16_s10, %s16_s10 }
   0xa   :  { %p641_p3 = scmp.ne.s32.totalorder %s16_s10, %s640_s20  ;;  %p646_p5 = scmp.lt.s32.totalorder %s640_s20, %s640_s20 }
   0xc   :  { %p647_p6 = por %p646_p5, %p645_p4 }
   0xe   :  { %p648_p7 = pnand %p647_p6, %p641_p3 }
  0x10   :  { %651 = shalt.err (!%p648_p7)
}
  0x11   :  { %18 = dma.hbm_to_vmem [thread:$0]  %s775_s0, 128, %s16_s10, [#allocation4]  }
  0x12   :  { %s652_s25 = scalar_lea.hbm %s776_s1, 6272 }
  0x13   :  { %p653_p8 = scmp.ne.s32.totalorder %s776_s1, %s652_s25  ;;  %p656_p9 = scmp.lt.u32.totalorder %s652_s25, %s776_s1 }
  0x15   :  { %p658_p10 = pnand %p656_p9, %p653_p8 }
  0x17   :  { %661 = shalt.err (!%p658_p10)
}
  0x18   :  { %s662_s30 = scalar_lea.vmem %s700_s12, 6272  ;;  %p667_p12 = scmp.lt.s32.totalorder %s700_s12, %s700_s12 }
  0x19   :  { %p663_p11 = scmp.ne.s32.totalorder %s700_s12, %s662_s30  ;;  %p668_p13 = scmp.lt.s32.totalorder %s662_s30, %s662_s30 }
  0x1b   :  { %p669_p0 = por %p668_p13, %p667_p12 }
  0x1d   :  { %p670_p1 = pnand %p669_p0, %p663_p11 }
  0x1f   :  { %673 = shalt.err (!%p670_p1)
}
  0x20   :  { %s680_s0 = smov 128   ;;  %s681_s3 = smov 8  }
  0x21   :  { %30 = dma.hbm_to_vmem [thread:$0]  %s776_s1, 6272, %s700_s12, [#allocation6], %s680_s0, %s680_s0, %s681_s3  }
  0x22   :  { %674 = dma.done.wait [#allocation4], 128  }
  0x23   :  { %675 = vsyncadd [#allocation4], 4294967168 }
  0x24   :  { %676 = dma.done.wait [#allocation6], 6272  }
  0x25   :  { %677 = vsyncadd [#allocation6], 4294961024  ;;  %v682_v0 = vmov 0.0|0.0   ;;  %v683_v1 = vmov 0.0   ;;  %vm684_vm0 = vmmov 0   ;;  %v42_v2 = vld [vmem:[#allocation5] sm:$0xff] }
  0x26   :  { %545 = vmatprep.subr.bf16.mxu0 %v682_v0  ;;  %37 = vst [vmem:[#allocation2] sm:$0xff] %v683_v1  ;;  %472 = vmatprep.mubr.msk.f32.mxu0 %vm684_vm0, %v683_v1  ;;  %v43_v3 = vld [vmem:[#allocation5 + $0x8] sm:$0xff]  ;;  %v44_v4 = vld [vmem:[#allocation5 + $0x10] sm:$0xff]  ;;  %v45_v6 = vld [vmem:[#allocation5 + $0x18] sm:$0xff]  ;;  %vm39_vm1 = vcmask 228352   ;;  %vm381_vm2 = vcmask 15360  }
  0x27   :  { %569 = vmatprep.subr.bf16.mxu1 %v682_v0  ;;  %507 = vmatprep.mubr.msk.f32.mxu1 %vm684_vm0, %v683_v1  ;;  %v546_v5 = vpack.c.bf16 %v43_v3, %v42_v2  ;;  %v549_v7 = vpack.c.bf16 %v45_v6, %v44_v4  ;;  %v46_v8 = vld [vmem:[#allocation5 + $0x20] sm:$0xff]  ;;  %v47_v9 = vld [vmem:[#allocation5 + $0x28] sm:$0xff]  ;;  %v38_v10 = vld [vmem:[#allocation3] sm:$0xff] }
  0x28   :  { %40 = vst.msk [vmem:[#allocation2] sm:$0xff] %vm39_vm1, %v38_v10  ;;  %v552_v11 = vpack.c.bf16 %v47_v9, %v46_v8  ;;  %v48_v12 = vld [vmem:[#allocation5 + $0x30] sm:$0xff]  ;;  %v49_v13 = vld [vmem:[#allocation5 + $0x38] sm:$0xff]  ;;  %v50_v15 = vld [vmem:[#allocation5 + $0x40] sm:$0xff] }
  0x29   :  { %547 = vmatpush3.bf16.msra.mxu0 %v546_v5  ;;  %v555_v14 = vpack.c.bf16 %v49_v13, %v48_v12  ;;  %v51_v16 = vld [vmem:[#allocation5 + $0x48] sm:$0xff]  ;;  %v52_v21 = vld [vmem:[#allocation5 + $0x50] sm:$0xff]  ;;  %v53_v22 = vld [vmem:[#allocation5 + $0x58] sm:$0xff] }
  0x2a   :  { %548 = vmatprep.subr.bf16.mxu0 %v682_v0  ;;  %v558_v20 = vpack.c.bf16 %v51_v16, %v50_v15  ;;  %v561_v27 = vpack.c.bf16 %v53_v22, %v52_v21  ;;  %v54_v28 = vld [vmem:[#allocation5 + $0x60] sm:$0xff]  ;;  %v55_v29 = vld [vmem:[#allocation5 + $0x68] sm:$0xff]  ;;  %v56_v35 = vld [vmem:[#allocation5 + $0x70] sm:$0xff] }
  0x2b   :  { %v564_v34 = vpack.c.bf16 %v55_v29, %v54_v28  ;;  %v57_v36 = vld [vmem:[#allocation5 + $0x78] sm:$0xff]  ;;  %v58_v50 = vld [vmem:[#allocation5 + $0x80] sm:$0xff]  ;;  %v59_v51 = vld [vmem:[#allocation5 + $0x88] sm:$0xff] }
  0x2c   :  { %v567_v41 = vpack.c.bf16 %v57_v36, %v56_v35  ;;  %v570_v52 = vpack.c.bf16 %v59_v51, %v58_v50  ;;  %v60_v53 = vld [vmem:[#allocation5 + $0x90] sm:$0xff]  ;;  %v61_v54 = vld [vmem:[#allocation5 + $0x98] sm:$0xff]  ;;  %v62_v56 = vld [vmem:[#allocation5 + $0xa0] sm:$0xff] }
  0x2d   :  { %550 = vmatpush3.bf16.msra.mxu0 %v549_v7  ;;  %v573_v55 = vpack.c.bf16 %v61_v54, %v60_v53  ;;  %v63_v57 = vld [vmem:[#allocation5 + $0xa8] sm:$0xff]  ;;  %v64_v59 = vld [vmem:[#allocation5 + $0xb0] sm:$0xff]  ;;  %v65_v60 = vld [vmem:[#allocation5 + $0xb8] sm:$0xff] }
  0x2e   :  { %551 = vmatprep.subr.bf16.mxu0 %v682_v0  ;;  %571 = vmatpush3.bf16.msra.mxu1 %v570_v52  ;;  %v576_v58 = vpack.c.bf16 %v63_v57, %v62_v56  ;;  %v579_v61 = vpack.c.bf16 %v65_v60, %v64_v59  ;;  %v66_v62 = vld [vmem:[#allocation5 + $0xc0] sm:$0xff]  ;;  %v67_v63 = vld [vmem:[#allocation5 + $0xc8] sm:$0xff]  ;;  %v68_v2 = vld [vmem:[#allocation5 + $0xd0] sm:$0xff] }
  0x2f   :  { %v41_v17 = vld [vmem:[#allocation2] sm:$0xff]  ;;  %572 = vmatprep.subr.bf16.mxu1 %v682_v0  ;;  %v69_v3 = vld [vmem:[#allocation5 + $0xd8] sm:$0xff]  ;;  %v70_v5 = vld [vmem:[#allocation5 + $0xe0] sm:$0xff] }
  0x30   :  { %v91_v18 = vrot.slane %v41_v17, 4  ;;  %v97_v19 = vmul.f32 %v41_v17, %v41_v17  ;;  %v585_v4 = vpack.c.bf16 %v69_v3, %v68_v2  ;;  %v71_v6 = vld [vmem:[#allocation5 + $0xe8] sm:$0xff]  ;;  %v72_v8 = vld [vmem:[#allocation5 + $0xf0] sm:$0xff]  ;;  %v73_v9 = vld [vmem:[#allocation5 + $0xf8] sm:$0xff] }
  0x31   :  { %553 = vmatpush3.bf16.msra.mxu0 %v552_v11  ;;  %v588_v7 = vpack.c.bf16 %v71_v6, %v70_v5  ;;  %v591_v10 = vpack.c.bf16 %v73_v9, %v72_v8  ;;  %v113_v11 = vlaneseq  ;;  %v80_v51 = vld [vmem:[#allocation5 + $0x130] sm:$0xff]  ;;  %v81_v52 = vld [vmem:[#allocation5 + $0x138] sm:$0xff]  ;;  %v82_v54 = vld [vmem:[#allocation5 + $0x140] sm:$0xff] }
  0x32   :  { %554 = vmatprep.subr.bf16.mxu0 %v682_v0  ;;  %v92_v23 = vadd.f32 %v91_v18, %v41_v17  ;;  %v98_v24 = vrot.slane %v97_v19, 4  ;;  %574 = vmatpush3.bf16.msra.mxu1 %v573_v55  ;;  %v603_v53 = vpack.c.bf16 %v81_v52, %v80_v51  ;;  %v83_v55 = vld [vmem:[#allocation5 + $0x148] sm:$0xff]  ;;  %v84_v57 = vld [vmem:[#allocation5 + $0x150] sm:$0xff]  ;;  %v86_v60 = vld [vmem:[#allocation5 + $0x160] sm:$0xff] }
  0x33   :  { %575 = vmatprep.subr.bf16.mxu1 %v682_v0  ;;  %v755_v12 = vshrl.u32 %v113_v11, 7  ;;  %v606_v56 = vpack.c.bf16 %v83_v55, %v82_v54 }
  0x34   :  { %v93_v25 = vrot.slane %v92_v23, 2  ;;  %v99_v26 = vadd.f32 %v98_v24, %v97_v19 }
  0x35   :  { %556 = vmatpush3.bf16.msra.mxu0 %v555_v14  ;;  %v115_v13 = vsub.s32 0, %v755_v12  ;;  %v758_v14 = vld [vmem:[#allocation5 + $0x180] sm:$0xff]  ;;  %v212_v3 = vsub.s32 1, %v755_v12 }
  0x36   :  { %557 = vmatprep.subr.bf16.mxu0 %v682_v0  ;;  %v94_v30 = vadd.f32 %v93_v25, %v92_v23  ;;  %v100_v31 = vrot.slane %v99_v26, 2  ;;  %577 = vmatpush3.bf16.msra.mxu1 %v576_v58  ;;  %v85_v58 = vld [vmem:[#allocation5 + $0x158] sm:$0xff] }
  0x37   :  { %578 = vmatprep.subr.bf16.mxu1 %v682_v0  ;;  %v116_v15 = vrot.slane %v758_v14, %v115_v13  ;;  %v609_v59 = vpack.c.bf16 %v85_v58, %v84_v57 }
  0x38   :  { %v95_v32 = vrot.slane %v94_v30, 1  ;;  %v101_v33 = vadd.f32 %v100_v31, %v99_v26 }
  0x39   :  { %559 = vmatpush3.bf16.msra.mxu0 %v558_v20 }
  0x3a   :  { %560 = vmatprep.subr.bf16.mxu0 %v682_v0  ;;  %v96_v37 = vadd.f32 %v95_v32, %v94_v30  ;;  %v102_v38 = vrot.slane %v101_v33, 1  ;;  %580 = vmatpush3.bf16.msra.mxu1 %v579_v61  ;;  %v87_v61 = vld [vmem:[#allocation5 + $0x168] sm:$0xff] }
  0x3b   :  { %581 = vmatprep.subr.bf16.mxu1 %v682_v0 }
  0x3c   :  { %v103_v39 = vadd.f32 %v102_v38, %v101_v33  ;;  %v104_v40 = vmul.f32 0.125, %v96_v37 }
  0x3d   :  { %562 = vmatpush3.bf16.msra.mxu0 %v561_v27 }
  0x3e   :  { %563 = vmatprep.subr.bf16.mxu0 %v682_v0  ;;  %v105_v42 = vmul.f32 0.125, %v103_v39  ;;  %v106_v43 = vmul.f32 %v104_v40, %v104_v40  ;;  %v109_v47 = vsub.f32 %v41_v17, %v104_v40 }
  0x40   :  { %v107_v44 = vsub.f32 %v105_v42, %v106_v43  ;;  %v74_v42 = vld [vmem:[#allocation5 + $0x100] sm:$0xff]  ;;  %v75_v43 = vld [vmem:[#allocation5 + $0x108] sm:$0xff] }
  0x41   :  { %565 = vmatpush3.bf16.msra.mxu0 %v564_v34 }
  0x42   :  { %566 = vmatprep.subr.bf16.mxu0 %v682_v0  ;;  %v108_v45 = vmax.f32 %v107_v44, 0.0  ;;  %v594_v44 = vpack.c.bf16 %v75_v43, %v74_v42 }
  0x44   :  { %v110_v46 = vadd.f32 1e-05, %v108_v45  ;;  %v76_v45 = vld [vmem:[#allocation5 + $0x110] sm:$0xff] }
  0x45   :  { %568 = vmatpush3.bf16.msra.mxu0 %v567_v41 }
  0x46   :  { %593 = vmatprep.subr.bf16.mxu0 %v682_v0  ;;  %624 = vrsqrt.f32 %v110_v46  ;;  %v77_v46 = vld [vmem:[#allocation5 + $0x118] sm:$0xff] }
  0x50   :  { %v625_v48 = vpop.eup %624 }
  0x51   :  { %v112_v49 = vmul.f32 %v625_v48, %v109_v47  ;;  %v597_v47 = vpack.c.bf16 %v77_v46, %v76_v45  ;;  %v78_v48 = vld [vmem:[#allocation5 + $0x120] sm:$0xff] }
  0x53   :  { %473 = vmatmul.mubr.f32.vlgmr.msra.gmra.mrb[0].mxu0 %v112_v49  ;;  %v79_v49 = vld [vmem:[#allocation5 + $0x128] sm:$0xff] }
  0x54   :  { %542 = vmatprep.mubr.msk.f32.mxu0 %vm684_vm0, %v683_v1  ;;  %v582_v1 = vpack.c.bf16 %v67_v63, %v66_v62  ;;  %595 = vmatpush3.bf16.msra.mxu0 %v594_v44  ;;  %v600_v50 = vpack.c.bf16 %v79_v49, %v78_v48  ;;  %v612_v62 = vpack.c.bf16 %v87_v61, %v86_v60  ;;  %v88_v63 = vld [vmem:[#allocation5 + $0x170] sm:$0xff] }
  0x55   :  { %596 = vmatprep.subr.bf16.mxu0 %v682_v0 }
  0x56   :  { %583 = vmatpush3.bf16.msra.mxu1 %v582_v1  ;;  %v89_v1 = vld [vmem:[#allocation5 + $0x178] sm:$0xff] }
  0x57   :  { %584 = vmatprep.subr.bf16.mxu1 %v682_v0  ;;  %v615_v2 = vpack.c.bf16 %v89_v1, %v88_v63 }
  0x58   :  { %598 = vmatpush3.bf16.msra.mxu0 %v597_v47 }
  0x59   :  { %599 = vmatprep.subr.bf16.mxu0 %v682_v0 }
  0x5a   :  { %586 = vmatpush3.bf16.msra.mxu1 %v585_v4  ;;  %v213_v4 = vrot.slane %v758_v14, %v212_v3 }
  0x5b   :  { %587 = vmatprep.subr.bf16.mxu1 %v682_v0 }
  0x5c   :  { %601 = vmatpush3.bf16.msra.mxu0 %v600_v50 }
  0x5d   :  { %602 = vmatprep.subr.bf16.mxu0 %v682_v0 }
  0x5e   :  { %589 = vmatpush3.bf16.msra.mxu1 %v588_v7 }
  0x5f   :  { %590 = vmatprep.subr.bf16.mxu1 %v682_v0 }
  0x60   :  { %604 = vmatpush3.bf16.msra.mxu0 %v603_v53 }
  0x61   :  { %605 = vmatprep.subr.bf16.mxu0 %v682_v0 }
  0x62   :  { %592 = vmatpush3.bf16.msra.mxu1 %v591_v10 }
  0x64   :  { %607 = vmatpush3.bf16.msra.mxu0 %v606_v56 }
  0x65   :  { %608 = vmatprep.subr.bf16.mxu0 %v682_v0 }
  0x68   :  { %610 = vmatpush3.bf16.msra.mxu0 %v609_v59 }
  0x69   :  { %611 = vmatprep.subr.bf16.mxu0 %v682_v0 }
  0x6c   :  { %613 = vmatpush3.bf16.msra.mxu0 %v612_v62 }
  0x6d   :  { %614 = vmatprep.subr.bf16.mxu0 %v682_v0 }
  0x70   :  { %616 = vmatpush3.bf16.msra.mxu0 %v615_v2 }
 0x126   :  { %v183_v16 = vpop.f32.mrb[0].mxu0 }
 0x127   :  { %v184_v17 = vadd.f32 %v183_v16, %v116_v15  ;;  %v474_v18 = vpop.f32.mrb[1].mxu0 }
 0x129   :  { %v187_v19 = vmax.f32 %v184_v17, 0.0 }
 0x12b   :  { %v188_v20 = vrot.slane %v187_v19, 4  ;;  %v194_v21 = vmul.f32 %v187_v19, %v187_v19 }
 0x12d   :  { %v189_v22 = vadd.f32 %v188_v20, %v187_v19  ;;  %v195_v23 = vrot.slane %v194_v21, 4 }
 0x12f   :  { %v190_v24 = vrot.slane %v189_v22, 2  ;;  %v196_v25 = vadd.f32 %v195_v23, %v194_v21 }
 0x131   :  { %v197_v26 = vrot.slane %v196_v25, 2  ;;  %v191_v27 = vadd.f32 %v190_v24, %v189_v22 }
 0x133   :  { %v198_v28 = vadd.f32 %v197_v26, %v196_v25  ;;  %v192_v29 = vrot.slane %v191_v27, 1 }
 0x135   :  { %v199_v30 = vrot.slane %v198_v28, 1  ;;  %v193_v31 = vadd.f32 %v192_v29, %v191_v27 }
 0x137   :  { %v200_v32 = vadd.f32 %v199_v30, %v198_v28  ;;  %v201_v33 = vmul.f32 0.125, %v193_v31 }
 0x139   :  { %v202_v34 = vmul.f32 0.125, %v200_v32  ;;  %v203_v35 = vmul.f32 %v201_v33, %v201_v33  ;;  %v206_v39 = vsub.f32 %v187_v19, %v201_v33  ;;  %v309_v32 = vsub.s32 2, %v755_v12 }
 0x13b   :  { %v204_v36 = vsub.f32 %v202_v34, %v203_v35  ;;  %v310_v33 = vrot.slane %v758_v14, %v309_v32 }
 0x13d   :  { %v205_v37 = vmax.f32 %v204_v36, 0.0 }
 0x13f   :  { %v207_v38 = vadd.f32 1e-05, %v205_v37 }
 0x141   :  { %626 = vrsqrt.f32 %v207_v38 }
 0x14b   :  { %v627_v40 = vpop.eup %626 }
 0x14c   :  { %v209_v41 = vmul.f32 %v627_v40, %v206_v39 }
 0x14e   :  { %508 = vmatmul.mubr.f32.vlgmr.msra.gmra.mrb[0].mxu1 %v209_v41 }
 0x221   :  { %v280_v5 = vpop.f32.mrb[0].mxu1 }
 0x222   :  { %v281_v6 = vadd.f32 %v280_v5, %v213_v4  ;;  %v509_v7 = vpop.f32.mrb[1].mxu1 }
 0x224   :  { %v284_v8 = vmax.f32 %v281_v6, 0.0 }
 0x226   :  { %v285_v9 = vrot.slane %v284_v8, 4  ;;  %v291_v10 = vmul.f32 %v284_v8, %v284_v8 }
 0x228   :  { %v286_v11 = vadd.f32 %v285_v9, %v284_v8  ;;  %v292_v13 = vrot.slane %v291_v10, 4 }
 0x22a   :  { %v287_v15 = vrot.slane %v286_v11, 2  ;;  %v293_v16 = vadd.f32 %v292_v13, %v291_v10 }
 0x22c   :  { %v288_v17 = vadd.f32 %v287_v15, %v286_v11  ;;  %v294_v18 = vrot.slane %v293_v16, 2 }
 0x22e   :  { %v289_v19 = vrot.slane %v288_v17, 1  ;;  %v295_v20 = vadd.f32 %v294_v18, %v293_v16 }
 0x230   :  { %v290_v0 = vadd.f32 %v289_v19, %v288_v17  ;;  %v296_v21 = vrot.slane %v295_v20, 1 }
 0x232   :  { %v297_v22 = vadd.f32 %v296_v21, %v295_v20  ;;  %v298_v23 = vmul.f32 0.125, %v290_v0 }
 0x234   :  { %v299_v24 = vmul.f32 0.125, %v297_v22  ;;  %v300_v25 = vmul.f32 %v298_v23, %v298_v23  ;;  %v303_v29 = vsub.f32 %v284_v8, %v298_v23 }
 0x236   :  { %v301_v26 = vsub.f32 %v299_v24, %v300_v25 }
 0x238   :  { %v302_v27 = vmax.f32 %v301_v26, 0.0 }
 0x23a   :  { %v304_v28 = vadd.f32 1e-05, %v302_v27 }
 0x23c   :  { %628 = vrsqrt.f32 %v304_v28 }
 0x246   :  { %v629_v30 = vpop.eup %628 }
 0x247   :  { %v306_v31 = vmul.f32 %v629_v30, %v303_v29 }
 0x249   :  { %543 = vmatmul.mubr.f32.vlgmr.msra.gmra.mrb[2].mxu0 %v306_v31 }
 0x31c   :  { %v377_v34 = vpop.f32.mrb[2].mxu0 }
 0x31d   :  { %v378_v35 = vadd.f32 %v377_v34, %v310_v33  ;;  %v544_v36 = vpop.f32.mrb[3].mxu0 }
 0x31f   :  { %382 = vst.msk [vmem:[%s777_s2] sm:$0xff] %vm381_vm2, %v378_v35 }
 0x320   :  { %387 = vsyncpa [#allocation4], 1 }
 0x321   :  { %388 = vsyncpa [#allocation6], 1 }

</bundles_post_ra>
